<compile_context>
chip_gen: v5e
topology: v5e:2x2
jax: 0.10.0
libtpu: 0.0.40
codegen_flags: <defaults>
</compile_context>

<pallas_src>
import jax
import jax.numpy as jnp
import numpy as np
from jax.experimental import pallas as pl
from jax.experimental.pallas import tpu as pltpu

_PI = float(np.pi)
_TWO_PI = float(2.0 * np.pi)


# ----------------------------------------------------------------------------
# in-kernel math helpers (elementwise, guaranteed-lowerable ops only)
# ----------------------------------------------------------------------------
def _recip(x):
    """Reciprocal on the EUP (approx) + one Newton step (~f32 accuracy)."""
    r = pl.reciprocal(x, approx=True)
    return r * (2.0 - x * r)


def _atan(z):
    """Cephes atanf-style polynomial approximation (|err| ~ 1e-7)."""
    sign = jnp.where(z < 0.0, -1.0, 1.0)
    x = jnp.abs(z)
    t3p8 = 2.414213562373095   # tan(3*pi/8)
    tp8 = 0.4142135623730950   # tan(pi/8)
    big = x > t3p8
    mid = jnp.logical_and(jnp.logical_not(big), x > tp8)
    y0 = jnp.where(big, _PI / 2, jnp.where(mid, _PI / 4, 0.0))
    xr = jnp.where(big, -_recip(x),
                   jnp.where(mid, (x - 1.0) * _recip(x + 1.0), x))
    z2 = xr * xr
    poly = ((((8.05374449538e-2 * z2 - 1.38776856032e-1) * z2
              + 1.99777106478e-1) * z2 - 3.33329491539e-1) * z2 * xr + xr)
    return sign * (y0 + poly)


def _atan2(y, x):
    a = _atan(y * _recip(x))        # garbage where x == 0; selected away below
    ang = jnp.where(x > 0, a, jnp.where(y >= 0, a + _PI, a - _PI))
    ang = jnp.where(x == 0,
                    jnp.where(y > 0, _PI / 2,
                              jnp.where(y < 0, -_PI / 2, 0.0)),
                    ang)
    return ang


# ----------------------------------------------------------------------------
# kernels
# ----------------------------------------------------------------------------
def _node_kernel(x_ref, nf_ref):
    # x_ref : (1, 4, N)   rows = [px, py, vx, vy]
    # nf_ref: (1, 12, N)  rows 0-4 sender / rows 5-11 receiver features
    px = x_ref[0, 0:1, :]
    py = x_ref[0, 1:2, :]
    vx = x_ref[0, 2:3, :]
    vy = x_ref[0, 3:4, :]
    # exact sqrt/divide here: this is O(N), not the hot path; zero-velocity
    # nodes yield NaN (0/0), exactly like the PyTorch reference.
    rho = jnp.sqrt(vx * vx + vy * vy)
    c = vx / rho
    s = vy / rho
    theta = _atan2(vy, vx)
    cvx = c * vx + s * vy            # Rinv @ vel
    cvy = c * vy - s * vx
    nf_ref[0, 0:1, :] = px
    nf_ref[0, 1:2, :] = py
    nf_ref[0, 2:3, :] = vx
    nf_ref[0, 3:4, :] = vy
    nf_ref[0, 4:5, :] = theta
    nf_ref[0, 5:6, :] = px
    nf_ref[0, 6:7, :] = py
    nf_ref[0, 7:8, :] = c
    nf_ref[0, 8:9, :] = s
    nf_ref[0, 9:10, :] = theta
    nf_ref[0, 10:11, :] = cvx
    nf_ref[0, 11:12, :] = cvy


def _edge_kernel(sf_ref, rf_ref, out_ref):
    # sf_ref : (1, 5, 8, T)  sender   [px, py, vx, vy, theta] gathered at send
    # rf_ref : (1, 7, 8, T)  receiver [px, py, c, s, theta, cvx, cvy] at recv
    # out_ref: (1, 11, 8, T) edge_attr rows (feature-major)
    pjx = sf_ref[0, 0]
    pjy = sf_ref[0, 1]
    vjx = sf_ref[0, 2]
    vjy = sf_ref[0, 3]
    thj = sf_ref[0, 4]
    pix = rf_ref[0, 0]
    piy = rf_ref[0, 1]
    ci = rf_ref[0, 2]
    si = rf_ref[0, 3]
    thi = rf_ref[0, 4]

    dx = pjx - pix
    dy = pjy - piy
    # relative position rotated into the receiver frame (R_i^-1 @ dp)
    rx = ci * dx + si * dy
    ry = ci * dy - si * dx
    out_ref[0, 0] = rx
    out_ref[0, 1] = ry

    # euler(R_i^-1 @ R_j) == wrap(theta_j - theta_i), normalized by pi
    d = thj - thi
    d = jnp.where(d > _PI, d - _TWO_PI, d)
    d = jnp.where(d <= -_PI, d + _TWO_PI, d)
    out_ref[0, 2] = d * (1.0 / _PI)

    out_ref[0, 3] = jnp.sqrt(dx * dx + dy * dy)     # node distance
    out_ref[0, 4] = _atan2(ry, rx)                  # spherical theta (symmetric)

    # sender velocity rotated into the receiver frame
    out_ref[0, 5] = ci * vjx + si * vjy
    out_ref[0, 6] = ci * vjy - si * vjx

    # rel_feat gathered at the receiver: [0, 0, canon_vel_i]
    zero = jnp.zeros_like(rx)
    out_ref[0, 7] = zero
    out_ref[0, 8] = zero
    out_ref[0, 9] = rf_ref[0, 5]
    out_ref[0, 10] = rf_ref[0, 6]


# ----------------------------------------------------------------------------
# wrapper
# ----------------------------------------------------------------------------
def _round_up(x, m):
    return ((x + m - 1) // m) * m


def localizer_forward(x, send_edges, recv_edges, *, max_edge_tile=8192):
    """x: [B, N, 4] float32, send/recv_edges: [E] int32 (shared across batch)."""
    B, N, F = x.shape
    assert F == 4, "num_dims=2 -> 4 input features (pos(2) + vel(2))"
    E = send_edges.shape[0]

    x_t = jnp.transpose(x, (0, 2, 1))                               # [B, 4, N]

    # -------- per-node kernel: fused 12-row node table ------------------------
    node_tab = pl.pallas_call(
        _node_kernel,
        out_shape=jax.ShapeDtypeStruct((B, 12, N), x.dtype),
        grid=(B,),
        in_specs=[pl.BlockSpec((1, 4, N), lambda b: (b, 0, 0))],
        out_specs=pl.BlockSpec((1, 12, N), lambda b: (b, 0, 0)),
        compiler_params=pltpu.CompilerParams(
            dimension_semantics=("parallel",)),
    )(x_t)

    # node-level module outputs (tiny, O(N) XLA glue)
    c = node_tab[:, 7, :]
    s = node_tab[:, 8, :]
    cvx = node_tab[:, 10, :]
    cvy = node_tab[:, 11, :]
    zeros = jnp.zeros_like(cvx)
    rel_feat = jnp.stack([zeros, zeros, cvx, cvy], axis=-1)         # [B, N, 4]
    R = jnp.stack([jnp.stack([c, -s], axis=-1),
                   jnp.stack([s, c], axis=-1)], axis=-2)            # [B, N, 2, 2]

    # -------- edge tiling: pad E, pack edge axis as (8 sublanes, lanes) --------
    SUB, LANE = 8, 128
    tile_edges = min(_round_up(max_edge_tile, SUB * LANE),
                     _round_up(E, SUB * LANE))
    E_pad = _round_up(E, tile_edges)
    lane_tile = tile_edges // SUB
    n_tiles = E_pad // tile_edges

    send_idx = send_edges.astype(jnp.int32)
    recv_idx = recv_edges.astype(jnp.int32)
    pad = E_pad - E
    if pad:
        zpad = jnp.zeros((pad,), jnp.int32)   # pad with node 0: valid, no NaNs
        send_idx = jnp.concatenate([send_idx, zpad])
        recv_idx = jnp.concatenate([recv_idx, zpad])

    # one XLA gather per role on the compact node tables
    # TODO(synk): an in-kernel gather (scalar-prefetched indices + VMEM-resident
    # node table) would drop this HBM round-trip, but Mosaic has no general
    # per-lane dynamic gather, so the gather stays in XLA glue.
    send_feat = jnp.take(node_tab[:, 0:5, :], send_idx, axis=2)     # [B, 5, E_pad]
    recv_feat = jnp.take(node_tab[:, 5:12, :], recv_idx, axis=2)    # [B, 7, E_pad]

    # free row-major reshape: edge axis -> (8 sublanes, lanes); same split is
    # applied to the output, so per-edge alignment is preserved elementwise.
    send_feat = send_feat.reshape(B, 5, SUB, E_pad // SUB)
    recv_feat = recv_feat.reshape(B, 7, SUB, E_pad // SUB)

    edge_t = pl.pallas_call(
        _edge_kernel,
        out_shape=jax.ShapeDtypeStruct((B, 11, SUB, E_pad // SUB), x.dtype),
        grid=(B, n_tiles),
        in_specs=[
            pl.BlockSpec((1, 5, SUB, lane_tile), lambda b, t: (b, 0, 0, t)),
            pl.BlockSpec((1, 7, SUB, lane_tile), lambda b, t: (b, 0, 0, t)),
        ],
        out_specs=pl.BlockSpec((1, 11, SUB, lane_tile),
                               lambda b, t: (b, 0, 0, t)),
        compiler_params=pltpu.CompilerParams(
            dimension_semantics=("parallel", "parallel"),
            vmem_limit_bytes=32 * 1024 * 1024),
    )(send_feat, recv_feat)

    # feature-major [B, 11, E] is available here for downstream consumers; the
    # module API requires [B, E, 11], so transpose exactly once at the end.
    edge_attr = edge_t.reshape(B, 11, E_pad)[:, :, :E]
    edge_attr = jnp.transpose(edge_attr, (0, 2, 1))                 # [B, E, 11]
    return rel_feat, R, edge_attr


# ----------------------------------------------------------------------------
# pure-JAX reference (same math, jnp.arctan2) for a sanity check
# ----------------------------------------------------------------------------
def ref_forward(x, send, recv):
    def rot_cs(vel):
        rho = jnp.sqrt(jnp.sum(vel * vel, axis=-1, keepdims=True))
        return vel[..., 0:1] / rho, vel[..., 1:2] / rho

    vel = x[..., 2:4]
    c, s = rot_cs(vel)
    canon = jnp.concatenate([c * vel[..., 0:1] + s * vel[..., 1:2],
                             c * vel[..., 1:2] - s * vel[..., 0:1]], -1)
    rel_feat = jnp.concatenate([jnp.zeros_like(canon), canon], -1)
    R = jnp.stack([jnp.concatenate([c, -s], -1),
                   jnp.concatenate([s, c], -1)], -2)
    x_j = x[:, send]
    x_i = x[:, recv]
    ci, si = rot_cs(x_i[..., 2:4])
    cj, sj = rot_cs(x_j[..., 2:4])
    dx = x_j[..., 0:1] - x_i[..., 0:1]
    dy = x_j[..., 1:2] - x_i[..., 1:2]
    rx = ci * dx + si * dy
    ry = ci * dy - si * dx
    euler = jnp.arctan2(ci * sj - si * cj, ci * cj + si * sj) / np.pi
    dist = jnp.sqrt(dx * dx + dy * dy)
    sph = jnp.arctan2(ry, rx)
    vjx, vjy = x_j[..., 2:3], x_j[..., 3:4]
    rvx = ci * vjx + si * vjy
    rvy = ci * vjy - si * vjx
    edge_attr = jnp.concatenate([rx, ry, euler, dist, sph, rvx, rvy,
                                 rel_feat[:, recv]], -1)
    return rel_feat, R, edge_attr


if __name__ == "__main__":
    B, N = 2, 8                      # batch, nodes
    key = jax.random.PRNGKey(0)
    x = jax.random.normal(key, (B, N, 4), dtype=jnp.float32)

    # fully-connected directed graph without self-loops, shared across batch
    send = jnp.array([i for i in range(N) for j in range(N) if i != j],
                     dtype=jnp.int32)
    recv = jnp.array([j for i in range(N) for j in range(N) if i != j],
                     dtype=jnp.int32)

    fwd = jax.jit(localizer_forward)
    rel_feat, R, edge_attr = fwd(x, send, recv)
    jax.block_until_ready((rel_feat, R, edge_attr))

    ref_rel, ref_R, ref_edge = ref_forward(x, send, recv)
    np.testing.assert_allclose(np.asarray(rel_feat), np.asarray(ref_rel),
                               atol=1e-4, rtol=1e-4)
    np.testing.assert_allclose(np.asarray(R), np.asarray(ref_R),
                               atol=1e-4, rtol=1e-4)
    np.testing.assert_allclose(np.asarray(edge_attr), np.asarray(ref_edge),
                               atol=1e-4, rtol=1e-4)

    assert rel_feat.shape == (B, N, 4)
    assert R.shape == (B, N, 2, 2)
    assert edge_attr.shape == (B, send.shape[0], 11)
    print("KERNEL_OK")
</pallas_src>

<mosaic_0001>
module attributes {stable_mosaic.version = 11 : i64} {
  func.func @_node_kernel(%arg0: i32, %arg1: memref<1x4x8xf32, #tpu.memory_space<vmem>>, %arg2: memref<1x12x8xf32, #tpu.memory_space<vmem>>) attributes {dimension_semantics = [#tpu.dimension_semantics<parallel>], iteration_bounds = array<i64: 2>, scalar_prefetch = 0 : i64, scratch_operands = 0 : i64, tpu.core_type = #tpu.core_type<tc>, window_params = [{transform_indices = @transform_0, window_bounds = array<i64: 1, 4, 8>}, {transform_indices = @transform_1, window_bounds = array<i64: 1, 12, 8>}]} {
    %c0 = arith.constant 0 : index
    %c0_0 = arith.constant 0 : index
    %c0_1 = arith.constant 0 : index
    %0 = vector.load %arg1[%c0, %c0_0, %c0_1] : memref<1x4x8xf32, #tpu.memory_space<vmem>>, vector<1x1x8xf32>
    %1 = vector.shape_cast %0 : vector<1x1x8xf32> to vector<1x8xf32>
    %c0_2 = arith.constant 0 : index
    %c1 = arith.constant 1 : index
    %c0_3 = arith.constant 0 : index
    %2 = vector.load %arg1[%c0_2, %c1, %c0_3] : memref<1x4x8xf32, #tpu.memory_space<vmem>>, vector<1x1x8xf32>
    %3 = vector.shape_cast %2 : vector<1x1x8xf32> to vector<1x8xf32>
    %c0_4 = arith.constant 0 : index
    %c2 = arith.constant 2 : index
    %c0_5 = arith.constant 0 : index
    %4 = vector.load %arg1[%c0_4, %c2, %c0_5] : memref<1x4x8xf32, #tpu.memory_space<vmem>>, vector<1x1x8xf32>
    %5 = vector.shape_cast %4 : vector<1x1x8xf32> to vector<1x8xf32>
    %c0_6 = arith.constant 0 : index
    %c3 = arith.constant 3 : index
    %c0_7 = arith.constant 0 : index
    %6 = vector.load %arg1[%c0_6, %c3, %c0_7] : memref<1x4x8xf32, #tpu.memory_space<vmem>>, vector<1x1x8xf32>
    %7 = vector.shape_cast %6 : vector<1x1x8xf32> to vector<1x8xf32>
    %8 = arith.mulf %5, %5 : vector<1x8xf32>
    %9 = arith.mulf %7, %7 : vector<1x8xf32>
    %10 = arith.addf %8, %9 : vector<1x8xf32>
    %11 = math.sqrt %10 : vector<1x8xf32>
    %12 = arith.divf %5, %11 : vector<1x8xf32>
    %13 = arith.divf %7, %11 : vector<1x8xf32>
    %14 = tpu.reciprocal %5 {approx = true} : vector<1x8xf32> -> vector<1x8xf32>
    %15 = arith.mulf %5, %14 : vector<1x8xf32>
    %cst = arith.constant 2.000000e+00 : f32
    %16 = vector.broadcast %cst : f32 to vector<1x8xf32>
    %17 = arith.subf %16, %15 : vector<1x8xf32>
    %18 = arith.mulf %14, %17 : vector<1x8xf32>
    %19 = arith.mulf %7, %18 : vector<1x8xf32>
    %cst_8 = arith.constant 0.000000e+00 : f32
    %20 = vector.broadcast %cst_8 : f32 to vector<1x8xf32>
    %21 = arith.cmpf olt, %19, %20 : vector<1x8xf32>
    %cst_9 = arith.constant -1.000000e+00 : f32
    %cst_10 = arith.constant 1.000000e+00 : f32
    %22 = vector.broadcast %cst_9 : f32 to vector<1x8xf32>
    %23 = vector.broadcast %cst_10 : f32 to vector<1x8xf32>
    %24 = arith.select %21, %22, %23 : vector<1x8xi1>, vector<1x8xf32>
    %25 = math.absf %19 : vector<1x8xf32>
    %cst_11 = arith.constant 2.41421366 : f32
    %26 = vector.broadcast %cst_11 : f32 to vector<1x8xf32>
    %27 = arith.cmpf ogt, %25, %26 : vector<1x8xf32>
    %cst_12 = arith.constant dense<true> : vector<1x8xi1>
    %28 = arith.xori %27, %cst_12 : vector<1x8xi1>
    %cst_13 = arith.constant 0.414213568 : f32
    %29 = vector.broadcast %cst_13 : f32 to vector<1x8xf32>
    %30 = arith.cmpf ogt, %25, %29 : vector<1x8xf32>
    %31 = arith.andi %28, %30 : vector<1x8xi1>
    %cst_14 = arith.constant 0.785398185 : f32
    %cst_15 = arith.constant 0.000000e+00 : f32
    %32 = vector.broadcast %cst_14 : f32 to vector<1x8xf32>
    %33 = vector.broadcast %cst_15 : f32 to vector<1x8xf32>
    %34 = arith.select %31, %32, %33 : vector<1x8xi1>, vector<1x8xf32>
    %cst_16 = arith.constant 1.57079637 : f32
    %35 = vector.broadcast %cst_16 : f32 to vector<1x8xf32>
    %36 = arith.select %27, %35, %34 : vector<1x8xi1>, vector<1x8xf32>
    %37 = tpu.reciprocal %25 {approx = true} : vector<1x8xf32> -> vector<1x8xf32>
    %38 = arith.mulf %25, %37 : vector<1x8xf32>
    %cst_17 = arith.constant 2.000000e+00 : f32
    %39 = vector.broadcast %cst_17 : f32 to vector<1x8xf32>
    %40 = arith.subf %39, %38 : vector<1x8xf32>
    %41 = arith.mulf %37, %40 : vector<1x8xf32>
    %cst_18 = arith.constant 0.000000e+00 : f32
    %42 = vector.broadcast %cst_18 : f32 to vector<1x8xf32>
    %43 = arith.subf %42, %41 : vector<1x8xf32>
    %cst_19 = arith.constant 1.000000e+00 : f32
    %44 = vector.broadcast %cst_19 : f32 to vector<1x8xf32>
    %45 = arith.subf %25, %44 : vector<1x8xf32>
    %cst_20 = arith.constant 1.000000e+00 : f32
    %46 = vector.broadcast %cst_20 : f32 to vector<1x8xf32>
    %47 = arith.addf %25, %46 : vector<1x8xf32>
    %48 = tpu.reciprocal %47 {approx = true} : vector<1x8xf32> -> vector<1x8xf32>
    %49 = arith.mulf %47, %48 : vector<1x8xf32>
    %cst_21 = arith.constant 2.000000e+00 : f32
    %50 = vector.broadcast %cst_21 : f32 to vector<1x8xf32>
    %51 = arith.subf %50, %49 : vector<1x8xf32>
    %52 = arith.mulf %48, %51 : vector<1x8xf32>
    %53 = arith.mulf %45, %52 : vector<1x8xf32>
    %54 = arith.select %31, %53, %25 : vector<1x8xi1>, vector<1x8xf32>
    %55 = arith.select %27, %43, %54 : vector<1x8xi1>, vector<1x8xf32>
    %56 = arith.mulf %55, %55 : vector<1x8xf32>
    %cst_22 = arith.constant 0.0805374458 : f32
    %57 = vector.broadcast %cst_22 : f32 to vector<1x8xf32>
    %58 = arith.mulf %57, %56 : vector<1x8xf32>
    %cst_23 = arith.constant 0.138776854 : f32
    %59 = vector.broadcast %cst_23 : f32 to vector<1x8xf32>
    %60 = arith.subf %58, %59 : vector<1x8xf32>
    %61 = arith.mulf %60, %56 : vector<1x8xf32>
    %cst_24 = arith.constant 0.199777111 : f32
    %62 = vector.broadcast %cst_24 : f32 to vector<1x8xf32>
    %63 = arith.addf %61, %62 : vector<1x8xf32>
    %64 = arith.mulf %63, %56 : vector<1x8xf32>
    %cst_25 = arith.constant 0.333329499 : f32
    %65 = vector.broadcast %cst_25 : f32 to vector<1x8xf32>
    %66 = arith.subf %64, %65 : vector<1x8xf32>
    %67 = arith.mulf %66, %56 : vector<1x8xf32>
    %68 = arith.mulf %67, %55 : vector<1x8xf32>
    %69 = arith.addf %68, %55 : vector<1x8xf32>
    %70 = arith.addf %36, %69 : vector<1x8xf32>
    %71 = arith.mulf %24, %70 : vector<1x8xf32>
    %cst_26 = arith.constant 0.000000e+00 : f32
    %72 = vector.broadcast %cst_26 : f32 to vector<1x8xf32>
    %73 = arith.cmpf ogt, %5, %72 : vector<1x8xf32>
    %cst_27 = arith.constant 0.000000e+00 : f32
    %74 = vector.broadcast %cst_27 : f32 to vector<1x8xf32>
    %75 = arith.cmpf oge, %7, %74 : vector<1x8xf32>
    %cst_28 = arith.constant 3.14159274 : f32
    %76 = vector.broadcast %cst_28 : f32 to vector<1x8xf32>
    %77 = arith.addf %71, %76 : vector<1x8xf32>
    %cst_29 = arith.constant 3.14159274 : f32
    %78 = vector.broadcast %cst_29 : f32 to vector<1x8xf32>
    %79 = arith.subf %71, %78 : vector<1x8xf32>
    %80 = arith.select %75, %77, %79 : vector<1x8xi1>, vector<1x8xf32>
    %81 = arith.select %73, %71, %80 : vector<1x8xi1>, vector<1x8xf32>
    %cst_30 = arith.constant 0.000000e+00 : f32
    %82 = vector.broadcast %cst_30 : f32 to vector<1x8xf32>
    %83 = arith.cmpf oeq, %5, %82 : vector<1x8xf32>
    %cst_31 = arith.constant 0.000000e+00 : f32
    %84 = vector.broadcast %cst_31 : f32 to vector<1x8xf32>
    %85 = arith.cmpf ogt, %7, %84 : vector<1x8xf32>
    %cst_32 = arith.constant 0.000000e+00 : f32
    %86 = vector.broadcast %cst_32 : f32 to vector<1x8xf32>
    %87 = arith.cmpf olt, %7, %86 : vector<1x8xf32>
    %cst_33 = arith.constant -1.57079637 : f32
    %cst_34 = arith.constant 0.000000e+00 : f32
    %88 = vector.broadcast %cst_33 : f32 to vector<1x8xf32>
    %89 = vector.broadcast %cst_34 : f32 to vector<1x8xf32>
    %90 = arith.select %87, %88, %89 : vector<1x8xi1>, vector<1x8xf32>
    %cst_35 = arith.constant 1.57079637 : f32
    %91 = vector.broadcast %cst_35 : f32 to vector<1x8xf32>
    %92 = arith.select %85, %91, %90 : vector<1x8xi1>, vector<1x8xf32>
    %93 = arith.select %83, %92, %81 : vector<1x8xi1>, vector<1x8xf32>
    %94 = arith.mulf %12, %5 : vector<1x8xf32>
    %95 = arith.mulf %13, %7 : vector<1x8xf32>
    %96 = arith.addf %94, %95 : vector<1x8xf32>
    %97 = arith.mulf %12, %7 : vector<1x8xf32>
    %98 = arith.mulf %13, %5 : vector<1x8xf32>
    %99 = arith.subf %97, %98 : vector<1x8xf32>
    %c0_36 = arith.constant 0 : index
    %c0_37 = arith.constant 0 : index
    %c0_38 = arith.constant 0 : index
    %100 = vector.load %arg2[%c0_36, %c0_37, %c0_38] : memref<1x12x8xf32, #tpu.memory_space<vmem>>, vector<1x1x8xf32>
    %101 = vector.shape_cast %100 : vector<1x1x8xf32> to vector<1x8xf32>
    %102 = vector.shape_cast %1 : vector<1x8xf32> to vector<1x1x8xf32>
    tpu.vector_store %arg2[%c0_36, %c0_37, %c0_38], %102 {strides = array<i32>} : memref<1x12x8xf32, #tpu.memory_space<vmem>>, vector<1x1x8xf32>,
    %c0_39 = arith.constant 0 : index
    %c1_40 = arith.constant 1 : index
    %c0_41 = arith.constant 0 : index
    %103 = vector.load %arg2[%c0_39, %c1_40, %c0_41] : memref<1x12x8xf32, #tpu.memory_space<vmem>>, vector<1x1x8xf32>
    %104 = vector.shape_cast %103 : vector<1x1x8xf32> to vector<1x8xf32>
    %105 = vector.shape_cast %3 : vector<1x8xf32> to vector<1x1x8xf32>
    tpu.vector_store %arg2[%c0_39, %c1_40, %c0_41], %105 {strides = array<i32>} : memref<1x12x8xf32, #tpu.memory_space<vmem>>, vector<1x1x8xf32>,
    %c0_42 = arith.constant 0 : index
    %c2_43 = arith.constant 2 : index
    %c0_44 = arith.constant 0 : index
    %106 = vector.load %arg2[%c0_42, %c2_43, %c0_44] : memref<1x12x8xf32, #tpu.memory_space<vmem>>, vector<1x1x8xf32>
    %107 = vector.shape_cast %106 : vector<1x1x8xf32> to vector<1x8xf32>
    %108 = vector.shape_cast %5 : vector<1x8xf32> to vector<1x1x8xf32>
    tpu.vector_store %arg2[%c0_42, %c2_43, %c0_44], %108 {strides = array<i32>} : memref<1x12x8xf32, #tpu.memory_space<vmem>>, vector<1x1x8xf32>,
    %c0_45 = arith.constant 0 : index
    %c3_46 = arith.constant 3 : index
    %c0_47 = arith.constant 0 : index
    %109 = vector.load %arg2[%c0_45, %c3_46, %c0_47] : memref<1x12x8xf32, #tpu.memory_space<vmem>>, vector<1x1x8xf32>
    %110 = vector.shape_cast %109 : vector<1x1x8xf32> to vector<1x8xf32>
    %111 = vector.shape_cast %7 : vector<1x8xf32> to vector<1x1x8xf32>
    tpu.vector_store %arg2[%c0_45, %c3_46, %c0_47], %111 {strides = array<i32>} : memref<1x12x8xf32, #tpu.memory_space<vmem>>, vector<1x1x8xf32>,
    %c0_48 = arith.constant 0 : index
    %c4 = arith.constant 4 : index
    %c0_49 = arith.constant 0 : index
    %112 = vector.load %arg2[%c0_48, %c4, %c0_49] : memref<1x12x8xf32, #tpu.memory_space<vmem>>, vector<1x1x8xf32>
    %113 = vector.shape_cast %112 : vector<1x1x8xf32> to vector<1x8xf32>
    %114 = vector.shape_cast %93 : vector<1x8xf32> to vector<1x1x8xf32>
    tpu.vector_store %arg2[%c0_48, %c4, %c0_49], %114 {strides = array<i32>} : memref<1x12x8xf32, #tpu.memory_space<vmem>>, vector<1x1x8xf32>,
    %c0_50 = arith.constant 0 : index
    %c5 = arith.constant 5 : index
    %c0_51 = arith.constant 0 : index
    %115 = vector.load %arg2[%c0_50, %c5, %c0_51] : memref<1x12x8xf32, #tpu.memory_space<vmem>>, vector<1x1x8xf32>
    %116 = vector.shape_cast %115 : vector<1x1x8xf32> to vector<1x8xf32>
    %117 = vector.shape_cast %1 : vector<1x8xf32> to vector<1x1x8xf32>
    tpu.vector_store %arg2[%c0_50, %c5, %c0_51], %117 {strides = array<i32>} : memref<1x12x8xf32, #tpu.memory_space<vmem>>, vector<1x1x8xf32>,
    %c0_52 = arith.constant 0 : index
    %c6 = arith.constant 6 : index
    %c0_53 = arith.constant 0 : index
    %118 = vector.load %arg2[%c0_52, %c6, %c0_53] : memref<1x12x8xf32, #tpu.memory_space<vmem>>, vector<1x1x8xf32>
    %119 = vector.shape_cast %118 : vector<1x1x8xf32> to vector<1x8xf32>
    %120 = vector.shape_cast %3 : vector<1x8xf32> to vector<1x1x8xf32>
    tpu.vector_store %arg2[%c0_52, %c6, %c0_53], %120 {strides = array<i32>} : memref<1x12x8xf32, #tpu.memory_space<vmem>>, vector<1x1x8xf32>,
    %c0_54 = arith.constant 0 : index
    %c7 = arith.constant 7 : index
    %c0_55 = arith.constant 0 : index
    %121 = vector.load %arg2[%c0_54, %c7, %c0_55] : memref<1x12x8xf32, #tpu.memory_space<vmem>>, vector<1x1x8xf32>
    %122 = vector.shape_cast %121 : vector<1x1x8xf32> to vector<1x8xf32>
    %123 = vector.shape_cast %12 : vector<1x8xf32> to vector<1x1x8xf32>
    tpu.vector_store %arg2[%c0_54, %c7, %c0_55], %123 {strides = array<i32>} : memref<1x12x8xf32, #tpu.memory_space<vmem>>, vector<1x1x8xf32>,
    %c0_56 = arith.constant 0 : index
    %c8 = arith.constant 8 : index
    %c0_57 = arith.constant 0 : index
    %124 = vector.load %arg2[%c0_56, %c8, %c0_57] : memref<1x12x8xf32, #tpu.memory_space<vmem>>, vector<1x1x8xf32>
    %125 = vector.shape_cast %124 : vector<1x1x8xf32> to vector<1x8xf32>
    %126 = vector.shape_cast %13 : vector<1x8xf32> to vector<1x1x8xf32>
    tpu.vector_store %arg2[%c0_56, %c8, %c0_57], %126 {strides = array<i32>} : memref<1x12x8xf32, #tpu.memory_space<vmem>>, vector<1x1x8xf32>,
    %c0_58 = arith.constant 0 : index
    %c9 = arith.constant 9 : index
    %c0_59 = arith.constant 0 : index
    %127 = vector.load %arg2[%c0_58, %c9, %c0_59] : memref<1x12x8xf32, #tpu.memory_space<vmem>>, vector<1x1x8xf32>
    %128 = vector.shape_cast %127 : vector<1x1x8xf32> to vector<1x8xf32>
    %129 = vector.shape_cast %93 : vector<1x8xf32> to vector<1x1x8xf32>
    tpu.vector_store %arg2[%c0_58, %c9, %c0_59], %129 {strides = array<i32>} : memref<1x12x8xf32, #tpu.memory_space<vmem>>, vector<1x1x8xf32>,
    %c0_60 = arith.constant 0 : index
    %c10 = arith.constant 10 : index
    %c0_61 = arith.constant 0 : index
    %130 = vector.load %arg2[%c0_60, %c10, %c0_61] : memref<1x12x8xf32, #tpu.memory_space<vmem>>, vector<1x1x8xf32>
    %131 = vector.shape_cast %130 : vector<1x1x8xf32> to vector<1x8xf32>
    %132 = vector.shape_cast %96 : vector<1x8xf32> to vector<1x1x8xf32>
    tpu.vector_store %arg2[%c0_60, %c10, %c0_61], %132 {strides = array<i32>} : memref<1x12x8xf32, #tpu.memory_space<vmem>>, vector<1x1x8xf32>,
    %c0_62 = arith.constant 0 : index
    %c11 = arith.constant 11 : index
    %c0_63 = arith.constant 0 : index
    %133 = vector.load %arg2[%c0_62, %c11, %c0_63] : memref<1x12x8xf32, #tpu.memory_space<vmem>>, vector<1x1x8xf32>
    %134 = vector.shape_cast %133 : vector<1x1x8xf32> to vector<1x8xf32>
    %135 = vector.shape_cast %99 : vector<1x8xf32> to vector<1x1x8xf32>
    tpu.vector_store %arg2[%c0_62, %c11, %c0_63], %135 {strides = array<i32>} : memref<1x12x8xf32, #tpu.memory_space<vmem>>, vector<1x1x8xf32>,
    return
  }
  func.func @transform_0(%arg0: i32) -> (i32, i32, i32) {
    %c0_i32 = arith.constant 0 : i32
    %c0_i32_0 = arith.constant 0 : i32
    %c0_i32_1 = arith.constant 0 : i32
    return %arg0, %c0_i32, %c0_i32_0 : i32, i32, i32
  }
  func.func @transform_1(%arg0: i32) -> (i32, i32, i32) {
    %c0_i32 = arith.constant 0 : i32
    %c0_i32_0 = arith.constant 0 : i32
    %c0_i32_1 = arith.constant 0 : i32
    return %arg0, %c0_i32, %c0_i32_0 : i32, i32, i32
  }
}

module attributes {stable_mosaic.version = 11 : i64} {
  func.func @_edge_kernel(%arg0: i32, %arg1: i32, %arg2: memref<1x5x8x128xf32, #tpu.memory_space<vmem>>, %arg3: memref<1x7x8x128xf32, #tpu.memory_space<vmem>>, %arg4: memref<1x11x8x128xf32, #tpu.memory_space<vmem>>) attributes {dimension_semantics = [#tpu.dimension_semantics<parallel>, #tpu.dimension_semantics<parallel>], iteration_bounds = array<i64: 2, 1>, scalar_prefetch = 0 : i64, scratch_operands = 0 : i64, tpu.core_type = #tpu.core_type<tc>, window_params = [{transform_indices = @transform_0, window_bounds = array<i64: 1, 5, 8, 128>}, {transform_indices = @transform_1, window_bounds = array<i64: 1, 7, 8, 128>}, {transform_indices = @transform_2, window_bounds = array<i64: 1, 11, 8, 128>}]} {
    %c0 = arith.constant 0 : index
    %c0_0 = arith.constant 0 : index
    %c0_1 = arith.constant 0 : index
    %c0_2 = arith.constant 0 : index
    %0 = vector.load %arg2[%c0, %c0_0, %c0_1, %c0_2] : memref<1x5x8x128xf32, #tpu.memory_space<vmem>>, vector<1x1x8x128xf32>
    %1 = vector.shape_cast %0 : vector<1x1x8x128xf32> to vector<8x128xf32>
    %c0_3 = arith.constant 0 : index
    %c1 = arith.constant 1 : index
    %c0_4 = arith.constant 0 : index
    %c0_5 = arith.constant 0 : index
    %2 = vector.load %arg2[%c0_3, %c1, %c0_4, %c0_5] : memref<1x5x8x128xf32, #tpu.memory_space<vmem>>, vector<1x1x8x128xf32>
    %3 = vector.shape_cast %2 : vector<1x1x8x128xf32> to vector<8x128xf32>
    %c0_6 = arith.constant 0 : index
    %c2 = arith.constant 2 : index
    %c0_7 = arith.constant 0 : index
    %c0_8 = arith.constant 0 : index
    %4 = vector.load %arg2[%c0_6, %c2, %c0_7, %c0_8] : memref<1x5x8x128xf32, #tpu.memory_space<vmem>>, vector<1x1x8x128xf32>
    %5 = vector.shape_cast %4 : vector<1x1x8x128xf32> to vector<8x128xf32>
    %c0_9 = arith.constant 0 : index
    %c3 = arith.constant 3 : index
    %c0_10 = arith.constant 0 : index
    %c0_11 = arith.constant 0 : index
    %6 = vector.load %arg2[%c0_9, %c3, %c0_10, %c0_11] : memref<1x5x8x128xf32, #tpu.memory_space<vmem>>, vector<1x1x8x128xf32>
    %7 = vector.shape_cast %6 : vector<1x1x8x128xf32> to vector<8x128xf32>
    %c0_12 = arith.constant 0 : index
    %c4 = arith.constant 4 : index
    %c0_13 = arith.constant 0 : index
    %c0_14 = arith.constant 0 : index
    %8 = vector.load %arg2[%c0_12, %c4, %c0_13, %c0_14] : memref<1x5x8x128xf32, #tpu.memory_space<vmem>>, vector<1x1x8x128xf32>
    %9 = vector.shape_cast %8 : vector<1x1x8x128xf32> to vector<8x128xf32>
    %c0_15 = arith.constant 0 : index
    %c0_16 = arith.constant 0 : index
    %c0_17 = arith.constant 0 : index
    %c0_18 = arith.constant 0 : index
    %10 = vector.load %arg3[%c0_15, %c0_16, %c0_17, %c0_18] : memref<1x7x8x128xf32, #tpu.memory_space<vmem>>, vector<1x1x8x128xf32>
    %11 = vector.shape_cast %10 : vector<1x1x8x128xf32> to vector<8x128xf32>
    %c0_19 = arith.constant 0 : index
    %c1_20 = arith.constant 1 : index
    %c0_21 = arith.constant 0 : index
    %c0_22 = arith.constant 0 : index
    %12 = vector.load %arg3[%c0_19, %c1_20, %c0_21, %c0_22] : memref<1x7x8x128xf32, #tpu.memory_space<vmem>>, vector<1x1x8x128xf32>
    %13 = vector.shape_cast %12 : vector<1x1x8x128xf32> to vector<8x128xf32>
    %c0_23 = arith.constant 0 : index
    %c2_24 = arith.constant 2 : index
    %c0_25 = arith.constant 0 : index
    %c0_26 = arith.constant 0 : index
    %14 = vector.load %arg3[%c0_23, %c2_24, %c0_25, %c0_26] : memref<1x7x8x128xf32, #tpu.memory_space<vmem>>, vector<1x1x8x128xf32>
    %15 = vector.shape_cast %14 : vector<1x1x8x128xf32> to vector<8x128xf32>
    %c0_27 = arith.constant 0 : index
    %c3_28 = arith.constant 3 : index
    %c0_29 = arith.constant 0 : index
    %c0_30 = arith.constant 0 : index
    %16 = vector.load %arg3[%c0_27, %c3_28, %c0_29, %c0_30] : memref<1x7x8x128xf32, #tpu.memory_space<vmem>>, vector<1x1x8x128xf32>
    %17 = vector.shape_cast %16 : vector<1x1x8x128xf32> to vector<8x128xf32>
    %c0_31 = arith.constant 0 : index
    %c4_32 = arith.constant 4 : index
    %c0_33 = arith.constant 0 : index
    %c0_34 = arith.constant 0 : index
    %18 = vector.load %arg3[%c0_31, %c4_32, %c0_33, %c0_34] : memref<1x7x8x128xf32, #tpu.memory_space<vmem>>, vector<1x1x8x128xf32>
    %19 = vector.shape_cast %18 : vector<1x1x8x128xf32> to vector<8x128xf32>
    %20 = arith.subf %1, %11 : vector<8x128xf32>
    %21 = arith.subf %3, %13 : vector<8x128xf32>
    %22 = arith.mulf %15, %20 : vector<8x128xf32>
    %23 = arith.mulf %17, %21 : vector<8x128xf32>
    %24 = arith.addf %22, %23 : vector<8x128xf32>
    %25 = arith.mulf %15, %21 : vector<8x128xf32>
    %26 = arith.mulf %17, %20 : vector<8x128xf32>
    %27 = arith.subf %25, %26 : vector<8x128xf32>
    %c0_35 = arith.constant 0 : index
    %c0_36 = arith.constant 0 : index
    %c0_37 = arith.constant 0 : index
    %c0_38 = arith.constant 0 : index
    %28 = vector.load %arg4[%c0_35, %c0_36, %c0_37, %c0_38] : memref<1x11x8x128xf32, #tpu.memory_space<vmem>>, vector<1x1x8x128xf32>
    %29 = vector.shape_cast %28 : vector<1x1x8x128xf32> to vector<8x128xf32>
    %30 = vector.shape_cast %24 : vector<8x128xf32> to vector<1x1x8x128xf32>
    tpu.vector_store %arg4[%c0_35, %c0_36, %c0_37, %c0_38], %30 {strides = array<i32>} : memref<1x11x8x128xf32, #tpu.memory_space<vmem>>, vector<1x1x8x128xf32>,
    %c0_39 = arith.constant 0 : index
    %c1_40 = arith.constant 1 : index
    %c0_41 = arith.constant 0 : index
    %c0_42 = arith.constant 0 : index
    %31 = vector.load %arg4[%c0_39, %c1_40, %c0_41, %c0_42] : memref<1x11x8x128xf32, #tpu.memory_space<vmem>>, vector<1x1x8x128xf32>
    %32 = vector.shape_cast %31 : vector<1x1x8x128xf32> to vector<8x128xf32>
    %33 = vector.shape_cast %27 : vector<8x128xf32> to vector<1x1x8x128xf32>
    tpu.vector_store %arg4[%c0_39, %c1_40, %c0_41, %c0_42], %33 {strides = array<i32>} : memref<1x11x8x128xf32, #tpu.memory_space<vmem>>, vector<1x1x8x128xf32>,
    %34 = arith.subf %9, %19 : vector<8x128xf32>
    %cst = arith.constant 3.14159274 : f32
    %35 = vector.broadcast %cst : f32 to vector<8x128xf32>
    %36 = arith.cmpf ogt, %34, %35 : vector<8x128xf32>
    %cst_43 = arith.constant 6.28318548 : f32
    %37 = vector.broadcast %cst_43 : f32 to vector<8x128xf32>
    %38 = arith.subf %34, %37 : vector<8x128xf32>
    %39 = arith.select %36, %38, %34 : vector<8x128xi1>, vector<8x128xf32>
    %cst_44 = arith.constant -3.14159274 : f32
    %40 = vector.broadcast %cst_44 : f32 to vector<8x128xf32>
    %41 = arith.cmpf ole, %39, %40 : vector<8x128xf32>
    %cst_45 = arith.constant 6.28318548 : f32
    %42 = vector.broadcast %cst_45 : f32 to vector<8x128xf32>
    %43 = arith.addf %39, %42 : vector<8x128xf32>
    %44 = arith.select %41, %43, %39 : vector<8x128xi1>, vector<8x128xf32>
    %cst_46 = arith.constant 0.318309873 : f32
    %45 = vector.broadcast %cst_46 : f32 to vector<8x128xf32>
    %46 = arith.mulf %44, %45 : vector<8x128xf32>
    %c0_47 = arith.constant 0 : index
    %c2_48 = arith.constant 2 : index
    %c0_49 = arith.constant 0 : index
    %c0_50 = arith.constant 0 : index
    %47 = vector.load %arg4[%c0_47, %c2_48, %c0_49, %c0_50] : memref<1x11x8x128xf32, #tpu.memory_space<vmem>>, vector<1x1x8x128xf32>
    %48 = vector.shape_cast %47 : vector<1x1x8x128xf32> to vector<8x128xf32>
    %49 = vector.shape_cast %46 : vector<8x128xf32> to vector<1x1x8x128xf32>
    tpu.vector_store %arg4[%c0_47, %c2_48, %c0_49, %c0_50], %49 {strides = array<i32>} : memref<1x11x8x128xf32, #tpu.memory_space<vmem>>, vector<1x1x8x128xf32>,
    %50 = arith.mulf %20, %20 : vector<8x128xf32>
    %51 = arith.mulf %21, %21 : vector<8x128xf32>
    %52 = arith.addf %50, %51 : vector<8x128xf32>
    %53 = math.sqrt %52 : vector<8x128xf32>
    %c0_51 = arith.constant 0 : index
    %c3_52 = arith.constant 3 : index
    %c0_53 = arith.constant 0 : index
    %c0_54 = arith.constant 0 : index
    %54 = vector.load %arg4[%c0_51, %c3_52, %c0_53, %c0_54] : memref<1x11x8x128xf32, #tpu.memory_space<vmem>>, vector<1x1x8x128xf32>
    %55 = vector.shape_cast %54 : vector<1x1x8x128xf32> to vector<8x128xf32>
    %56 = vector.shape_cast %53 : vector<8x128xf32> to vector<1x1x8x128xf32>
    tpu.vector_store %arg4[%c0_51, %c3_52, %c0_53, %c0_54], %56 {strides = array<i32>} : memref<1x11x8x128xf32, #tpu.memory_space<vmem>>, vector<1x1x8x128xf32>,
    %57 = tpu.reciprocal %24 {approx = true} : vector<8x128xf32> -> vector<8x128xf32>
    %58 = arith.mulf %24, %57 : vector<8x128xf32>
    %cst_55 = arith.constant 2.000000e+00 : f32
    %59 = vector.broadcast %cst_55 : f32 to vector<8x128xf32>
    %60 = arith.subf %59, %58 : vector<8x128xf32>
    %61 = arith.mulf %57, %60 : vector<8x128xf32>
    %62 = arith.mulf %27, %61 : vector<8x128xf32>
    %cst_56 = arith.constant 0.000000e+00 : f32
    %63 = vector.broadcast %cst_56 : f32 to vector<8x128xf32>
    %64 = arith.cmpf olt, %62, %63 : vector<8x128xf32>
    %cst_57 = arith.constant -1.000000e+00 : f32
    %cst_58 = arith.constant 1.000000e+00 : f32
    %65 = vector.broadcast %cst_57 : f32 to vector<8x128xf32>
    %66 = vector.broadcast %cst_58 : f32 to vector<8x128xf32>
    %67 = arith.select %64, %65, %66 : vector<8x128xi1>, vector<8x128xf32>
    %68 = math.absf %62 : vector<8x128xf32>
    %cst_59 = arith.constant 2.41421366 : f32
    %69 = vector.broadcast %cst_59 : f32 to vector<8x128xf32>
    %70 = arith.cmpf ogt, %68, %69 : vector<8x128xf32>
    %cst_60 = arith.constant dense<true> : vector<8x128xi1>
    %71 = arith.xori %70, %cst_60 : vector<8x128xi1>
    %cst_61 = arith.constant 0.414213568 : f32
    %72 = vector.broadcast %cst_61 : f32 to vector<8x128xf32>
    %73 = arith.cmpf ogt, %68, %72 : vector<8x128xf32>
    %74 = arith.andi %71, %73 : vector<8x128xi1>
    %cst_62 = arith.constant 0.785398185 : f32
    %cst_63 = arith.constant 0.000000e+00 : f32
    %75 = vector.broadcast %cst_62 : f32 to vector<8x128xf32>
    %76 = vector.broadcast %cst_63 : f32 to vector<8x128xf32>
    %77 = arith.select %74, %75, %76 : vector<8x128xi1>, vector<8x128xf32>
    %cst_64 = arith.constant 1.57079637 : f32
    %78 = vector.broadcast %cst_64 : f32 to vector<8x128xf32>
    %79 = arith.select %70, %78, %77 : vector<8x128xi1>, vector<8x128xf32>
    %80 = tpu.reciprocal %68 {approx = true} : vector<8x128xf32> -> vector<8x128xf32>
    %81 = arith.mulf %68, %80 : vector<8x128xf32>
    %cst_65 = arith.constant 2.000000e+00 : f32
    %82 = vector.broadcast %cst_65 : f32 to vector<8x128xf32>
    %83 = arith.subf %82, %81 : vector<8x128xf32>
    %84 = arith.mulf %80, %83 : vector<8x128xf32>
    %cst_66 = arith.constant 0.000000e+00 : f32
    %85 = vector.broadcast %cst_66 : f32 to vector<8x128xf32>
    %86 = arith.subf %85, %84 : vector<8x128xf32>
    %cst_67 = arith.constant 1.000000e+00 : f32
    %87 = vector.broadcast %cst_67 : f32 to vector<8x128xf32>
    %88 = arith.subf %68, %87 : vector<8x128xf32>
    %cst_68 = arith.constant 1.000000e+00 : f32
    %89 = vector.broadcast %cst_68 : f32 to vector<8x128xf32>
    %90 = arith.addf %68, %89 : vector<8x128xf32>
    %91 = tpu.reciprocal %90 {approx = true} : vector<8x128xf32> -> vector<8x128xf32>
    %92 = arith.mulf %90, %91 : vector<8x128xf32>
    %cst_69 = arith.constant 2.000000e+00 : f32
    %93 = vector.broadcast %cst_69 : f32 to vector<8x128xf32>
    %94 = arith.subf %93, %92 : vector<8x128xf32>
    %95 = arith.mulf %91, %94 : vector<8x128xf32>
    %96 = arith.mulf %88, %95 : vector<8x128xf32>
    %97 = arith.select %74, %96, %68 : vector<8x128xi1>, vector<8x128xf32>
    %98 = arith.select %70, %86, %97 : vector<8x128xi1>, vector<8x128xf32>
    %99 = arith.mulf %98, %98 : vector<8x128xf32>
    %cst_70 = arith.constant 0.0805374458 : f32
    %100 = vector.broadcast %cst_70 : f32 to vector<8x128xf32>
    %101 = arith.mulf %100, %99 : vector<8x128xf32>
    %cst_71 = arith.constant 0.138776854 : f32
    %102 = vector.broadcast %cst_71 : f32 to vector<8x128xf32>
    %103 = arith.subf %101, %102 : vector<8x128xf32>
    %104 = arith.mulf %103, %99 : vector<8x128xf32>
    %cst_72 = arith.constant 0.199777111 : f32
    %105 = vector.broadcast %cst_72 : f32 to vector<8x128xf32>
    %106 = arith.addf %104, %105 : vector<8x128xf32>
    %107 = arith.mulf %106, %99 : vector<8x128xf32>
    %cst_73 = arith.constant 0.333329499 : f32
    %108 = vector.broadcast %cst_73 : f32 to vector<8x128xf32>
    %109 = arith.subf %107, %108 : vector<8x128xf32>
    %110 = arith.mulf %109, %99 : vector<8x128xf32>
    %111 = arith.mulf %110, %98 : vector<8x128xf32>
    %112 = arith.addf %111, %98 : vector<8x128xf32>
    %113 = arith.addf %79, %112 : vector<8x128xf32>
    %114 = arith.mulf %67, %113 : vector<8x128xf32>
    %cst_74 = arith.constant 0.000000e+00 : f32
    %115 = vector.broadcast %cst_74 : f32 to vector<8x128xf32>
    %116 = arith.cmpf ogt, %24, %115 : vector<8x128xf32>
    %cst_75 = arith.constant 0.000000e+00 : f32
    %117 = vector.broadcast %cst_75 : f32 to vector<8x128xf32>
    %118 = arith.cmpf oge, %27, %117 : vector<8x128xf32>
    %cst_76 = arith.constant 3.14159274 : f32
    %119 = vector.broadcast %cst_76 : f32 to vector<8x128xf32>
    %120 = arith.addf %114, %119 : vector<8x128xf32>
    %cst_77 = arith.constant 3.14159274 : f32
    %121 = vector.broadcast %cst_77 : f32 to vector<8x128xf32>
    %122 = arith.subf %114, %121 : vector<8x128xf32>
    %123 = arith.select %118, %120, %122 : vector<8x128xi1>, vector<8x128xf32>
    %124 = arith.select %116, %114, %123 : vector<8x128xi1>, vector<8x128xf32>
    %cst_78 = arith.constant 0.000000e+00 : f32
    %125 = vector.broadcast %cst_78 : f32 to vector<8x128xf32>
    %126 = arith.cmpf oeq, %24, %125 : vector<8x128xf32>
    %cst_79 = arith.constant 0.000000e+00 : f32
    %127 = vector.broadcast %cst_79 : f32 to vector<8x128xf32>
    %128 = arith.cmpf ogt, %27, %127 : vector<8x128xf32>
    %cst_80 = arith.constant 0.000000e+00 : f32
    %129 = vector.broadcast %cst_80 : f32 to vector<8x128xf32>
    %130 = arith.cmpf olt, %27, %129 : vector<8x128xf32>
    %cst_81 = arith.constant -1.57079637 : f32
    %cst_82 = arith.constant 0.000000e+00 : f32
    %131 = vector.broadcast %cst_81 : f32 to vector<8x128xf32>
    %132 = vector.broadcast %cst_82 : f32 to vector<8x128xf32>
    %133 = arith.select %130, %131, %132 : vector<8x128xi1>, vector<8x128xf32>
    %cst_83 = arith.constant 1.57079637 : f32
    %134 = vector.broadcast %cst_83 : f32 to vector<8x128xf32>
    %135 = arith.select %128, %134, %133 : vector<8x128xi1>, vector<8x128xf32>
    %136 = arith.select %126, %135, %124 : vector<8x128xi1>, vector<8x128xf32>
    %c0_84 = arith.constant 0 : index
    %c4_85 = arith.constant 4 : index
    %c0_86 = arith.constant 0 : index
    %c0_87 = arith.constant 0 : index
    %137 = vector.load %arg4[%c0_84, %c4_85, %c0_86, %c0_87] : memref<1x11x8x128xf32, #tpu.memory_space<vmem>>, vector<1x1x8x128xf32>
    %138 = vector.shape_cast %137 : vector<1x1x8x128xf32> to vector<8x128xf32>
    %139 = vector.shape_cast %136 : vector<8x128xf32> to vector<1x1x8x128xf32>
    tpu.vector_store %arg4[%c0_84, %c4_85, %c0_86, %c0_87], %139 {strides = array<i32>} : memref<1x11x8x128xf32, #tpu.memory_space<vmem>>, vector<1x1x8x128xf32>,
    %140 = arith.mulf %15, %5 : vector<8x128xf32>
    %141 = arith.mulf %17, %7 : vector<8x128xf32>
    %142 = arith.addf %140, %141 : vector<8x128xf32>
    %c0_88 = arith.constant 0 : index
    %c5 = arith.constant 5 : index
    %c0_89 = arith.constant 0 : index
    %c0_90 = arith.constant 0 : index
    %143 = vector.load %arg4[%c0_88, %c5, %c0_89, %c0_90] : memref<1x11x8x128xf32, #tpu.memory_space<vmem>>, vector<1x1x8x128xf32>
    %144 = vector.shape_cast %143 : vector<1x1x8x128xf32> to vector<8x128xf32>
    %145 = vector.shape_cast %142 : vector<8x128xf32> to vector<1x1x8x128xf32>
    tpu.vector_store %arg4[%c0_88, %c5, %c0_89, %c0_90], %145 {strides = array<i32>} : memref<1x11x8x128xf32, #tpu.memory_space<vmem>>, vector<1x1x8x128xf32>,
    %146 = arith.mulf %15, %7 : vector<8x128xf32>
    %147 = arith.mulf %17, %5 : vector<8x128xf32>
    %148 = arith.subf %146, %147 : vector<8x128xf32>
    %c0_91 = arith.constant 0 : index
    %c6 = arith.constant 6 : index
    %c0_92 = arith.constant 0 : index
    %c0_93 = arith.constant 0 : index
    %149 = vector.load %arg4[%c0_91, %c6, %c0_92, %c0_93] : memref<1x11x8x128xf32, #tpu.memory_space<vmem>>, vector<1x1x8x128xf32>
    %150 = vector.shape_cast %149 : vector<1x1x8x128xf32> to vector<8x128xf32>
    %151 = vector.shape_cast %148 : vector<8x128xf32> to vector<1x1x8x128xf32>
    tpu.vector_store %arg4[%c0_91, %c6, %c0_92, %c0_93], %151 {strides = array<i32>} : memref<1x11x8x128xf32, #tpu.memory_space<vmem>>, vector<1x1x8x128xf32>,
    %cst_94 = arith.constant 0.000000e+00 : f32
    %152 = vector.broadcast %cst_94 : f32 to vector<8x128xf32>
    %c0_95 = arith.constant 0 : index
    %c7 = arith.constant 7 : index
    %c0_96 = arith.constant 0 : index
    %c0_97 = arith.constant 0 : index
    %153 = vector.load %arg4[%c0_95, %c7, %c0_96, %c0_97] : memref<1x11x8x128xf32, #tpu.memory_space<vmem>>, vector<1x1x8x128xf32>
    %154 = vector.shape_cast %153 : vector<1x1x8x128xf32> to vector<8x128xf32>
    %155 = vector.shape_cast %152 : vector<8x128xf32> to vector<1x1x8x128xf32>
    tpu.vector_store %arg4[%c0_95, %c7, %c0_96, %c0_97], %155 {strides = array<i32>} : memref<1x11x8x128xf32, #tpu.memory_space<vmem>>, vector<1x1x8x128xf32>,
    %c0_98 = arith.constant 0 : index
    %c8 = arith.constant 8 : index
    %c0_99 = arith.constant 0 : index
    %c0_100 = arith.constant 0 : index
    %156 = vector.load %arg4[%c0_98, %c8, %c0_99, %c0_100] : memref<1x11x8x128xf32, #tpu.memory_space<vmem>>, vector<1x1x8x128xf32>
    %157 = vector.shape_cast %156 : vector<1x1x8x128xf32> to vector<8x128xf32>
    %158 = vector.shape_cast %152 : vector<8x128xf32> to vector<1x1x8x128xf32>
    tpu.vector_store %arg4[%c0_98, %c8, %c0_99, %c0_100], %158 {strides = array<i32>} : memref<1x11x8x128xf32, #tpu.memory_space<vmem>>, vector<1x1x8x128xf32>,
    %c0_101 = arith.constant 0 : index
    %c5_102 = arith.constant 5 : index
    %c0_103 = arith.constant 0 : index
    %c0_104 = arith.constant 0 : index
    %159 = vector.load %arg3[%c0_101, %c5_102, %c0_103, %c0_104] : memref<1x7x8x128xf32, #tpu.memory_space<vmem>>, vector<1x1x8x128xf32>
    %160 = vector.shape_cast %159 : vector<1x1x8x128xf32> to vector<8x128xf32>
    %c0_105 = arith.constant 0 : index
    %c9 = arith.constant 9 : index
    %c0_106 = arith.constant 0 : index
    %c0_107 = arith.constant 0 : index
    %161 = vector.load %arg4[%c0_105, %c9, %c0_106, %c0_107] : memref<1x11x8x128xf32, #tpu.memory_space<vmem>>, vector<1x1x8x128xf32>
    %162 = vector.shape_cast %161 : vector<1x1x8x128xf32> to vector<8x128xf32>
    %163 = vector.shape_cast %160 : vector<8x128xf32> to vector<1x1x8x128xf32>
    tpu.vector_store %arg4[%c0_105, %c9, %c0_106, %c0_107], %163 {strides = array<i32>} : memref<1x11x8x128xf32, #tpu.memory_space<vmem>>, vector<1x1x8x128xf32>,
    %c0_108 = arith.constant 0 : index
    %c6_109 = arith.constant 6 : index
    %c0_110 = arith.constant 0 : index
    %c0_111 = arith.constant 0 : index
    %164 = vector.load %arg3[%c0_108, %c6_109, %c0_110, %c0_111] : memref<1x7x8x128xf32, #tpu.memory_space<vmem>>, vector<1x1x8x128xf32>
    %165 = vector.shape_cast %164 : vector<1x1x8x128xf32> to vector<8x128xf32>
    %c0_112 = arith.constant 0 : index
    %c10 = arith.constant 10 : index
    %c0_113 = arith.constant 0 : index
    %c0_114 = arith.constant 0 : index
    %166 = vector.load %arg4[%c0_112, %c10, %c0_113, %c0_114] : memref<1x11x8x128xf32, #tpu.memory_space<vmem>>, vector<1x1x8x128xf32>
    %167 = vector.shape_cast %166 : vector<1x1x8x128xf32> to vector<8x128xf32>
    %168 = vector.shape_cast %165 : vector<8x128xf32> to vector<1x1x8x128xf32>
    tpu.vector_store %arg4[%c0_112, %c10, %c0_113, %c0_114], %168 {strides = array<i32>} : memref<1x11x8x128xf32, #tpu.memory_space<vmem>>, vector<1x1x8x128xf32>,
    return
  }
  func.func @transform_0(%arg0: i32, %arg1: i32) -> (i32, i32, i32, i32) {
    %c0_i32 = arith.constant 0 : i32
    %c0_i32_0 = arith.constant 0 : i32
    %c0_i32_1 = arith.constant 0 : i32
    return %arg0, %c0_i32, %c0_i32_0, %arg1 : i32, i32, i32, i32
  }
  func.func @transform_1(%arg0: i32, %arg1: i32) -> (i32, i32, i32, i32) {
    %c0_i32 = arith.constant 0 : i32
    %c0_i32_0 = arith.constant 0 : i32
    %c0_i32_1 = arith.constant 0 : i32
    return %arg0, %c0_i32, %c0_i32_0, %arg1 : i32, i32, i32, i32
  }
  func.func @transform_2(%arg0: i32, %arg1: i32) -> (i32, i32, i32, i32) {
    %c0_i32 = arith.constant 0 : i32
    %c0_i32_0 = arith.constant 0 : i32
    %c0_i32_1 = arith.constant 0 : i32
    return %arg0, %c0_i32, %c0_i32_0, %arg1 : i32, i32, i32, i32
  }
}

</mosaic_0001>

<bundles_post_ra>
// kernel: neg.0
= control target key start
LH: loop header
LB: loop body
LE: loop exit
PB: predicated region body
PF: predicated region fallthrough
CT: control target
= control target key end

     0   :  { %s24_s0 = inlined_call_operand.vmem [shape: f32[2,8,1], index: 0, kind: input, shape index: {}]   ;;  %s25_s1 = inlined_call_operand.vmem [shape: f32[2,8,1], index: 1, kind: output, shape index: {}]  }
   0x1   :  { %v2_v0 = vld [vmem:[%s24_s0] sm:$0x3] }
   0x2   :  { %v5_v1 = vxor.u32 2147483648, %v2_v0 }
   0x4   :  { %7 = vst [vmem:[%s25_s1] sm:$0x3] %v5_v1 }

// kernel: localizer_forward.2
= control target key start
LH: loop header
LB: loop body
LE: loop exit
PB: predicated region body
PF: predicated region fallthrough
CT: control target
= control target key end

     0   :  { %6 = vsyncpa [#allocation3], 0  ;;  %s627_s0 = inlined_call_operand.hbm [shape: f32[2,4,8], index: 0, kind: input, shape index: {}]   ;;  %s628_s1 = inlined_call_operand.vmem [shape: f32[2,12,8], index: 1, kind: output, shape index: {}]  }
   0x1   :  { %8 = vsyncpa [#allocation3 + $0x1], 0  ;;  %s456_s6 = smov 0   ;;  %s458_s7 = smov 0  }
   0x2   :  { %s460_s8 = smov 0   ;;  %s462_s9 = smov 0  }
   0x3 LB: > { %s475_s10 = sadd.s32 4294967295, %s441_s9   ;;  %s478_s11 = sadd.s32 1, %s441_s9   ;;  %s441_s9 = sphi %s462_s9, %s637_s9   ;;  %s437_s8 = sphi %s460_s8, %s636_s8   ;;  %s433_s7 = sphi %s458_s7, %s635_s7   ;;  %s429_s6 = sphi %s456_s6, %s634_s6  }
   0x4   : > { %s18_s12 = ssub.s32 %s441_s9, %s478_s11  ;;  %s21_s13 = sadd.s32 1, %s437_s8 }
   0x5   : > { %p19_p0 = scmp.eq.s32.totalorder %s18_s12, 0  ;;  %p28_p1 = scmp.ne.s32.totalorder %s437_s8, %s433_s7 }
   0x6   : > { %p29_p2 = scmp.eq.s32.totalorder %s441_s9, 0  ;;  %p34_p3 = scmp.ne.s32.totalorder %s433_s7, %s429_s6 }
   0x7   : > { %s488_s14 = scalar_select %p19_p0, %s437_s8, %s21_s13  }
   0x8   : > { %p490_p4 = por %p29_p2, %p28_p1  ;;  %p35_p5 = scmp.eq.s32.totalorder %s475_s10, 0 }
   0x9   : > { %p331_p6 = scmp.lt.s32.totalorder %s441_s9, 2  ;;  %s84_s17 = sand.u32 1, %s437_s8  }
   0xa   : > { %p496_p7 = por %p35_p5, %p34_p3  ;;  %s312_s18 = sshll.u32 %s84_s17, 2 }
   0xb   : > { %s313_s19 = sshll.u32 %s441_s9, 2  ;;  %s88_s23 = scalar_lea.vmem [#allocation2], %s312_s18 }
   0xc   : > { %s92_s22 = scalar_lea.hbm %s627_s0, %s313_s19  ;;  %s96_s24 = sshll.u32 %s88_s23, 4  ;;  %s97_s24 = int_to_ptr.vmem [resolvable:$true] %s96_s24 }
   0xd   : > { %s94_s25 = sshll.u32 %s92_s22, 4  ;;  %p507_p8 = pnand %p331_p6, %p490_p4  ;;  %s95_s25 = int_to_ptr.hbm [resolvable:$true] %s94_s25 }
   0xe   : > { %p314_p9 = scmp.ge.s32.totalorder %s441_s9, 1  ;;  %p101_p10 = scmp.lt.s32.totalorder %s441_s9, 3 }
   0xf   : > { %s85_s27 = scalar_lea.sflag [#allocation3], %s84_s17  ;;  %s377_s28 = sshra.s32 %s95_s25, 4  ;;  %s378_s28 = int_to_ptr.hbm [resolvable:$true] %s377_s28 }
  0x10   : > { %s379_s29 = scalar_lea.hbm %s378_s28, 4  ;;  %p381_p12 = pneg %p507_p8 }
  0x11   : > { %p380_p11 = scmp.ne.s32.totalorder %s378_s28, %s379_s29  ;;  %s384_s3 = scalar_lea.hbm %s627_s0, 8 }
  0x12   : > { %p385_p1 = scmp.lt.s32.totalorder %s378_s28, %s627_s0  ;;  %p386_p2 = scmp.lt.s32.totalorder %s384_s3, %s379_s29 }
  0x13   : > { %p382_p13 = pnand %p381_p12, %p380_p11 }
  0x14   : > { %p387_p3 = por %p386_p2, %p385_p1 }
  0x15   : > { %p383_p0 = pneg %p382_p13 }
  0x17   : > { %p388_p4 = pnand %p387_p3, %p383_p0 }
  0x19   : > { %391 = shalt.err (!%p388_p4)
}
  0x1a   : > { %330 = dma.hbm_to_vmem [thread:$0]  (!%p507_p8), %s95_s25, 64, %s97_s24, %s85_s27  }
  0x1b   : > { %p102_p5 = pnand %p314_p9, %p101_p10 }
  0x1c   : > { %s107_s6 = sand.u32 (!%p102_p5), 1, %s433_s7  }
  0x1d   : > { %105 = sbr.rel (%p102_p5) target bundleno = 104 (0x68), region = 24  ;;  %s315_s12 = sshll.u32 (!%p102_p5), %s107_s6, 2 }
  0x1e   : > { %s108_s13 = scalar_lea.sflag (!%p102_p5), [#allocation3], %s107_s6  ;;  %s111_s15 = scalar_lea.vmem (!%p102_p5), [#allocation2], %s315_s12 }
  0x22   : > { %424 = dma.done.wait (%p496_p7), %s108_s13, 64  }
  0x23   : > { %426 = vsyncadd (%p496_p7), %s108_s13, 4294967232  ;;  %p131_p6 = scmp.lt.s32.totalorder %s475_s10, 1  ;;  %vm229_vm0 = vcmask 57344   ;;  %v136_v0 = vld [vmem:[%s111_s15] sm:$0x1]  ;;  %vm443_vm4 = vmmov 1  }
  0x24   : > { %v137_v1 = vld [vmem:[%s111_s15 + $0x1] sm:$0x1]  ;;  %v539_v2 = vld [vmem:[%s111_s15 + $0x2] sm:$0x1]  ;;  %v545_v4 = vld [vmem:[%s111_s15 + $0x3] sm:$0x1] }
  0x25   : > { %s639_s10 = smov (!%p131_p6, %s475_s10), 1  ;;  %v140_v3 = vmul.f32 %v539_v2, %v539_v2  ;;  %367 = vrcp.f32 %v539_v2  ;;  %v141_v5 = vmul.f32 %v545_v4, %v545_v4  ;;  %v444_v63 = vmov 0.0  }
  0x26   : > { %s324_s17 = sshll.u32 %s639_s10, 4  ;;  %vm219_vm13 = vcmp.lt.f32.partialorder %v545_v4, 0.0  ;;  %vm218_vm14 = vcmp.gt.f32.partialorder %v545_v4, 0.0  ;;  %vm212_vm15 = vcmp.ge.f32.partialorder %v545_v4, 0.0 }
  0x27   : > { %s537_s19 = scalar_lea.vmem %s628_s1, %s324_s17  ;;  %v142_v6 = vadd.f32 %v141_v5, %v140_v3 }
  0x28   : > { %230 = vst.msk [vmem:[%s537_s19] sm:$0x1] %vm229_vm0, %v136_v0 }
  0x29   : > { %235 = vst.msk [vmem:[%s537_s19 + $0x5] sm:$0x1] %vm229_vm0, %v136_v0  ;;  %369 = vrsqrt.f32 %v142_v6  ;;  %vm150_vm1 = vcmp.eq.f32.partialorder %v142_v6, inf  ;;  %v153_v20 = vand.u32 2147483648, %v142_v6  ;;  %vm152_vm2 = vcmp.eq.f32.partialorder %v142_v6, 0.0 }
  0x2a   : > { %231 = vst.msk [vmem:[%s537_s19 + $0x1] sm:$0x1] %vm229_vm0, %v137_v1 }
  0x2b   : > { %236 = vst.msk [vmem:[%s537_s19 + $0x6] sm:$0x1] %vm229_vm0, %v137_v1  ;;  %v368_v7 = vpop.eup %367 }
  0x2c   : > { %232 = vst.msk [vmem:[%s537_s19 + $0x2] sm:$0x1] %vm229_vm0, %v539_v2  ;;  %v172_v8 = vmul.f32 %v368_v7, %v539_v2 }
  0x2d   : > { %233 = vst.msk [vmem:[%s537_s19 + $0x3] sm:$0x1] %vm229_vm0, %v545_v4 }
  0x2e   : > { %v173_v9 = vsub.f32 2.0, %v172_v8 }
  0x2f   : > { %v370_v10 = vpop.eup %369 }
  0x30   : > { %v174_v11 = vmul.f32 %v368_v7, %v173_v9  ;;  %v144_v12 = vmul.f32 %v370_v10, %v142_v6  ;;  %v445_v7 = vmov 1.0  }
  0x32   : > { %v564_v13 = vmul.f32 %v174_v11, %v545_v4  ;;  %v145_v14 = vmul.f32 %v370_v10, %v144_v12  ;;  %v220_v11 = vsel %vm219_vm13, -1.5707964, %v444_v63 }
  0x34   : > { %v567_v15 = vand.u32 2147483647, %v564_v13  ;;  %v146_v16 = vmul.f32 0.5, %v145_v14  ;;  %vm176_vm12 = vcmp.lt.f32.partialorder %v564_v13, 0.0  ;;  %v221_v14 = vsel %vm218_vm14, 1.5707964, %v220_v11 }
  0x35   : > { %v177_v8 = vsel %vm176_vm12, -1.0, %v445_v7 }
  0x36   : > { %371 = vrcp.f32 %v567_v15  ;;  %v191_v17 = vadd.f32 1.0, %v567_v15  ;;  %v147_v18 = vsub.f32 1.5, %v146_v16  ;;  %vm179_vm3 = vcmp.gt.f32.partialorder %v567_v15, 2.4142137 }
  0x37   : > { %vm180_vm5 = vmxor %vm179_vm3, %vm443_vm4  ;;  %vm181_vm6 = vcmp.gt.f32.partialorder %v567_v15, 0.41421357  ;;  %v318_v30 = vadd.f32 -1.0, %v567_v15 }
  0x38   : > { %373 = vrcp.f32 %v191_v17  ;;  %v148_v19 = vmul.f32 %v370_v10, %v147_v18  ;;  %vm577_vm7 = vmand %vm180_vm5, %vm181_vm6 }
  0x39   : > { %v183_v0 = vsel %vm577_vm7, 0.7853982, %v444_v63 }
  0x3a   : > { %v149_v21 = vmul.f32 %v148_v19, %v142_v6  ;;  %v184_v5 = vsel %vm179_vm3, 1.5707964, %v183_v0 }
  0x3c   : > { %v372_v22 = vpop.eup %371  ;;  %v151_v24 = vsel %vm150_vm1, %v142_v6, %v149_v21  ;;  %vm211_vm1 = vcmp.gt.f32.partialorder %v539_v2, 0.0 }
  0x3d   : > { %v186_v23 = vmul.f32 %v372_v22, %v567_v15  ;;  %v154_v25 = vsel %vm152_vm2, %v153_v20, %v151_v24  ;;  %vm217_vm2 = vcmp.eq.f32.partialorder %v539_v2, 0.0 }
  0x3e   : > { %v374_v26 = vpop.eup %373  ;;  %375 = vrcp.f32 %v154_v25  ;;  %vm160_vm8 = vweird.f32 %v154_v25  ;;  %v166_v38 = vand.u32 2147483648, %v154_v25  ;;  %v164_v41 = vand.u32 2147483647, %v154_v25 }
  0x3f   : > { %v187_v27 = vsub.f32 2.0, %v186_v23  ;;  %v193_v28 = vmul.f32 %v374_v26, %v191_v17 }
  0x40   : > { %v167_v45 = vor.u32 1.1754944e-38, %v166_v38  ;;  %vm165_vm11 = vcmp.eq.f32.partialorder %v164_v41, 8.507059e+37 }
  0x41   : > { %v188_v29 = vmul.f32 %v372_v22, %v187_v27  ;;  %v194_v31 = vsub.f32 2.0, %v193_v28 }
  0x43   : > { %v195_v32 = vmul.f32 %v374_v26, %v194_v31  ;;  %v189_v35 = vsub.f32 0.0, %v188_v29 }
  0x44   : > { %v376_v33 = vpop.eup %375 }
  0x45   : > { %v196_v36 = vmul.f32 %v318_v30, %v195_v32  ;;  %v156_v37 = vmul.f32 %v376_v33, %v154_v25  ;;  %vm161_vm9 = vweird.f32 %v376_v33 }
  0x46   : > { %vm162_vm10 = vmor %vm160_vm8, %vm161_vm9 }
  0x47   : > { %v197_v39 = vsel %vm577_vm7, %v196_v36, %v567_v15  ;;  %v157_v40 = vsub.f32 1.0, %v156_v37 }
  0x48   : > { %v198_v42 = vsel %vm179_vm3, %v189_v35, %v197_v39 }
  0x49   : > { %v199_v43 = vmul.f32 %v198_v42, %v198_v42  ;;  %v158_v44 = vmul.f32 %v376_v33, %v157_v40 }
  0x4b   : > { %v200_v46 = vmul.f32 0.080537446, %v199_v43  ;;  %v159_v47 = vadd.f32 %v376_v33, %v158_v44 }
  0x4d   : > { %v319_v48 = vadd.f32 -0.13877685, %v200_v46  ;;  %v163_v49 = vsel %vm162_vm10, %v376_v33, %v159_v47 }
  0x4e   : > { %v168_v50 = vsel %vm165_vm11, %v167_v45, %v163_v49 }
  0x4f   : > { %v202_v51 = vmul.f32 %v319_v48, %v199_v43  ;;  %v169_v52 = vmul.f32 %v168_v50, %v539_v2  ;;  %v170_v53 = vmul.f32 %v168_v50, %v545_v4 }
  0x51   : > { %v203_v54 = vadd.f32 0.19977711, %v202_v51  ;;  %237 = vst.msk [vmem:[%s537_s19 + $0x7] sm:$0x1] %vm229_vm0, %v169_v52  ;;  %v223_v55 = vmul.f32 %v169_v52, %v539_v2  ;;  %v224_v56 = vmul.f32 %v170_v53, %v545_v4  ;;  %v226_v57 = vmul.f32 %v169_v52, %v545_v4 }
  0x52   : > { %238 = vst.msk [vmem:[%s537_s19 + $0x8] sm:$0x1] %vm229_vm0, %v170_v53  ;;  %v227_v58 = vmul.f32 %v170_v53, %v539_v2 }
  0x53   : > { %v204_v59 = vmul.f32 %v203_v54, %v199_v43  ;;  %v225_v60 = vadd.f32 %v224_v56, %v223_v55 }
  0x54   : > { %v228_v61 = vsub.f32 %v226_v57, %v227_v58 }
  0x55   : > { %v320_v62 = vadd.f32 -0.3333295, %v204_v59  ;;  %240 = vst.msk [vmem:[%s537_s19 + $0xa] sm:$0x1] %vm229_vm0, %v225_v60 }
  0x56   : > { %241 = vst.msk [vmem:[%s537_s19 + $0xb] sm:$0x1] %vm229_vm0, %v228_v61 }
  0x57   : > { %v206_v1 = vmul.f32 %v320_v62, %v199_v43 }
  0x59   : > { %v207_v3 = vmul.f32 %v206_v1, %v198_v42 }
  0x5b   : > { %v208_v6 = vadd.f32 %v207_v3, %v198_v42 }
  0x5d   : > { %v209_v9 = vadd.f32 %v208_v6, %v184_v5 }
  0x5f   : > { %v210_v10 = vmul.f32 %v209_v9, %v177_v8 }
  0x61   : > { %v213_v12 = vadd.f32 3.1415927, %v210_v10  ;;  %v321_v13 = vadd.f32 -3.1415927, %v210_v10 }
  0x63   : > { %v215_v15 = vsel %vm212_vm15, %v213_v12, %v321_v13 }
  0x64   : > { %v216_v16 = vsel %vm211_vm1, %v210_v10, %v215_v15 }
  0x65   : > { %v222_v17 = vsel %vm217_vm2, %v221_v14, %v216_v16 }
  0x66   : > { %234 = vst.msk [vmem:[%s537_s19 + $0x4] sm:$0x1] %vm229_vm0, %v222_v17 }
  0x67   : > { %239 = vst.msk [vmem:[%s537_s19 + $0x9] sm:$0x1] %vm229_vm0, %v222_v17 }
  0x68 PF: > { %p11_p7 = scmp.ge.s32.totalorder %s478_s11, 4   ;;  %s634_s6 = smov %s433_s7 }
  0x69   : > { %s635_s7 = smov %s437_s8  ;;  %s636_s8 = smov %s488_s14 }
  0x6a   : > { %s637_s9 = smov %s478_s11  ;;  %13 = sbr.rel (!%p11_p7) target bundleno = 3 (0x3), region = 64 }
  0x6f   :  { %263 = vsyncpa [#allocation3], 1 }
  0x70   :  { %265 = vsyncpa [#allocation3 + $0x1], 1 }

// kernel: localizer_forward.3
= control target key start
LH: loop header
LB: loop body
LE: loop exit
PB: predicated region body
PF: predicated region fallthrough
CT: control target
= control target key end

     0   :  { %s554_s9 = smov 0   ;;  %s556_s10 = smov 0   ;;  %s664_s0 = inlined_call_operand.vmem [shape: f32[2,5,8,128], index: 0, kind: input, shape index: {}]   ;;  %s665_s1 = inlined_call_operand.vmem [shape: f32[2,7,8,128], index: 1, kind: input, shape index: {}]   ;;  %s666_s2 = inlined_call_operand.vmem [shape: f32[2,11,8,128], index: 2, kind: output, shape index: {}]  }
   0x1   :  { %s558_s11 = smov 0  }
   0x2 LB: > { %s24_s12 = sadd.s32 1, %s530_s10  ;;  %p443_p0 = scmp.ge.s32.totalorder %s534_s11, 1  ;;  %s534_s11 = sphi %s558_s11, %s12_s11   ;;  %s530_s10 = sphi %s556_s10, %s670_s10   ;;  %s526_s9 = sphi %s554_s9, %s669_s9  }
   0x3   : > { %p26_p1 = scmp.ge.s32.totalorder %s24_s12, 2  ;;  %p146_p2 = scmp.lt.s32.totalorder %s534_s11, 3 }
   0x5   : > { %s672_s12 = smov (%p26_p1, %s24_s12), 0  ;;  %p147_p3 = pnand %p443_p0, %p146_p2 }
   0x6   : > { %p182_p4 = scmp.lt.s32.totalorder (!%p147_p3), %s526_s9, 1 }
   0x7   : > { %150 = sbr.rel (%p147_p3) target bundleno = 92 (0x5c), region = 28 }
   0xc   : > { %s674_s9 = smov (!%p182_p4, %s526_s9), 1  ;;  %v536_v10 = vmov 0.0   ;;  %vm537_vm5 = vmmov 1  }
   0xd   : > { %s474_s13 = smul.u32 40, %s674_s9 }
   0xe   : > { %s475_s14 = smul.u32 56, %s674_s9 }
   0xf   : > { %s575_s17 = scalar_lea.vmem %s664_s0, %s474_s13  ;;  %s476_s18 = smul.u32 88, %s674_s9 }
  0x10   : > { %s580_s21 = scalar_lea.vmem %s665_s1, %s475_s14  ;;  %v206_v0 = vld [vmem:[%s575_s17] sm:$0xff]  ;;  %v447_v1 = vld [vmem:[%s575_s17 + $0x8] sm:$0xff]  ;;  %v448_v51 = vld [vmem:[%s575_s17 + $0x10] sm:$0xff] }
  0x11   : > { %v450_v2 = vld [vmem:[%s575_s17 + $0x20] sm:$0xff]  ;;  %s588_s24 = scalar_lea.vmem %s666_s2, %s476_s18  ;;  %v451_v4 = vld [vmem:[%s580_s21 + $0x8] sm:$0xff]  ;;  %v593_v5 = vld [vmem:[%s580_s21 + $0x10] sm:$0xff] }
  0x12   : > { %v215_v3 = vld [vmem:[%s580_s21] sm:$0xff]  ;;  %v596_v6 = vld [vmem:[%s580_s21 + $0x18] sm:$0xff]  ;;  %v225_v8 = vsub.f32 %v447_v1, %v451_v4  ;;  %466 = vst [vmem:[%s588_s24 + $0x38] sm:$0xff] %v536_v10  ;;  %v316_v53 = vmul.f32 %v593_v5, %v448_v51 }
  0x13   : > { %v224_v7 = vsub.f32 %v206_v0, %v215_v3  ;;  %v454_v9 = vld [vmem:[%s580_s21 + $0x20] sm:$0xff]  ;;  %467 = vst [vmem:[%s588_s24 + $0x40] sm:$0xff] %v536_v10  ;;  %v449_v52 = vld [vmem:[%s575_s17 + $0x18] sm:$0xff]  ;;  %v322_v62 = vmul.f32 %v596_v6, %v448_v51  ;;  %v468_v0 = vld [vmem:[%s580_s21 + $0x28] sm:$0xff] }
  0x14   : > { %v235_v11 = vsub.f32 %v450_v2, %v454_v9  ;;  %v227_v13 = vmul.f32 %v596_v6, %v225_v8  ;;  %v246_v15 = vmul.f32 %v225_v8, %v225_v8  ;;  %v229_v16 = vmul.f32 %v593_v5, %v225_v8  ;;  %v470_v2 = vld [vmem:[%s580_s21 + $0x30] sm:$0xff]  ;;  %469 = vst [vmem:[%s588_s24 + $0x48] sm:$0xff] %v468_v0 }
  0x15   : > { %v226_v12 = vmul.f32 %v593_v5, %v224_v7  ;;  %v245_v14 = vmul.f32 %v224_v7, %v224_v7  ;;  %v230_v17 = vmul.f32 %v596_v6, %v224_v7  ;;  %v317_v54 = vmul.f32 %v596_v6, %v449_v52  ;;  %471 = vst [vmem:[%s588_s24 + $0x50] sm:$0xff] %v470_v2 }
  0x16   : > { %vm236_vm0 = vcmp.gt.f32.partialorder %v235_v11, 3.1415927  ;;  %v456_v18 = vadd.f32 -6.2831855, %v235_v11  ;;  %v321_v57 = vmul.f32 %v593_v5, %v449_v52 }
  0x17   : > { %v607_v19 = vadd.f32 %v227_v13, %v226_v12  ;;  %v247_v20 = vadd.f32 %v246_v15, %v245_v14  ;;  %v609_v21 = vsub.f32 %v229_v16, %v230_v17  ;;  %v318_v61 = vadd.f32 %v317_v54, %v316_v53 }
  0x18   : > { %v238_v22 = vsel %vm236_vm0, %v456_v18, %v235_v11  ;;  %v323_v1 = vsub.f32 %v321_v57, %v322_v62  ;;  %v538_v18 = vmov 1.0  }
  0x19   : > { %232 = vst [vmem:[%s588_s24] sm:$0xff] %v607_v19  ;;  %vm239_vm1 = vcmp.le.f32.partialorder %v238_v22, -3.1415927  ;;  %v240_v23 = vadd.f32 6.2831855, %v238_v22  ;;  %504 = vrsqrt.f32 %v247_v20  ;;  %vm255_vm2 = vcmp.eq.f32.partialorder %v247_v20, inf }
  0x1a   : > { %455 = vst [vmem:[%s588_s24 + $0x8] sm:$0xff] %v609_v21  ;;  %506 = vrcp.f32 %v607_v19  ;;  %v258_v37 = vand.u32 2147483648, %v247_v20  ;;  %vm257_vm3 = vcmp.eq.f32.partialorder %v247_v20, 0.0  ;;  %vm310_vm8 = vcmp.lt.f32.partialorder %v609_v21, 0.0 }
  0x1b   : > { %v241_v24 = vsel %vm239_vm1, %v240_v23, %v238_v22  ;;  %vm309_vm9 = vcmp.gt.f32.partialorder %v609_v21, 0.0  ;;  %v311_v56 = vsel %vm310_vm8, -1.5707964, %v536_v10  ;;  %464 = vst [vmem:[%s588_s24 + $0x28] sm:$0xff] %v318_v61  ;;  %vm303_vm12 = vcmp.ge.f32.partialorder %v609_v21, 0.0 }
  0x1c   : > { %v242_v25 = vmul.f32 0.31830987, %v241_v24  ;;  %v312_v60 = vsel %vm309_vm9, 1.5707964, %v311_v56  ;;  %465 = vst [vmem:[%s588_s24 + $0x30] sm:$0xff] %v323_v1  ;;  %vm302_vm13 = vcmp.gt.f32.partialorder %v607_v19, 0.0 }
  0x1d   : > { %vm308_vm14 = vcmp.eq.f32.partialorder %v607_v19, 0.0 }
  0x1e   : > { %457 = vst [vmem:[%s588_s24 + $0x10] sm:$0xff] %v242_v25 }
  0x1f   : > { %v505_v26 = vpop.eup %504 }
  0x20   : > { %v507_v27 = vpop.eup %506  ;;  %v249_v28 = vmul.f32 %v505_v26, %v247_v20 }
  0x21   : > { %v263_v29 = vmul.f32 %v507_v27, %v607_v19 }
  0x22   : > { %v250_v30 = vmul.f32 %v505_v26, %v249_v28 }
  0x23   : > { %v264_v31 = vsub.f32 2.0, %v263_v29 }
  0x24   : > { %v251_v32 = vmul.f32 0.5, %v250_v30 }
  0x25   : > { %v265_v33 = vmul.f32 %v507_v27, %v264_v31 }
  0x26   : > { %v252_v34 = vsub.f32 1.5, %v251_v32 }
  0x27   : > { %v619_v35 = vmul.f32 %v265_v33, %v609_v21 }
  0x28   : > { %v253_v36 = vmul.f32 %v505_v26, %v252_v34 }
  0x29   : > { %v269_v38 = vand.u32 2147483647, %v619_v35  ;;  %vm267_vm11 = vcmp.lt.f32.partialorder %v619_v35, 0.0 }
  0x2a   : > { %v254_v39 = vmul.f32 %v253_v36, %v247_v20 }
  0x2b   : > { %508 = vrcp.f32 %v269_v38  ;;  %v282_v41 = vadd.f32 1.0, %v269_v38  ;;  %vm270_vm4 = vcmp.gt.f32.partialorder %v269_v38, 2.4142137  ;;  %vm272_vm7 = vcmp.gt.f32.partialorder %v269_v38, 0.41421357 }
  0x2c   : > { %v256_v40 = vsel %vm255_vm2, %v247_v20, %v254_v39  ;;  %vm271_vm6 = vmxor %vm270_vm4, %vm537_vm5  ;;  %v459_v49 = vadd.f32 -1.0, %v269_v38  ;;  %v268_v20 = vsel %vm267_vm11, -1.0, %v538_v18 }
  0x2d   : > { %v259_v42 = vsel %vm257_vm3, %v258_v37, %v256_v40  ;;  %510 = vrcp.f32 %v282_v41  ;;  %vm632_vm10 = vmand %vm271_vm6, %vm272_vm7 }
  0x2e   : > { %458 = vst [vmem:[%s588_s24 + $0x18] sm:$0xff] %v259_v42  ;;  %v274_v13 = vsel %vm632_vm10, 0.7853982, %v536_v10 }
  0x2f   : > { %v275_v16 = vsel %vm270_vm4, 1.5707964, %v274_v13 }
  0x31   : > { %v509_v43 = vpop.eup %508 }
  0x32   : > { %v277_v44 = vmul.f32 %v509_v43, %v269_v38 }
  0x33   : > { %v511_v45 = vpop.eup %510 }
  0x34   : > { %v278_v46 = vsub.f32 2.0, %v277_v44  ;;  %v284_v47 = vmul.f32 %v511_v45, %v282_v41 }
  0x36   : > { %v279_v48 = vmul.f32 %v509_v43, %v278_v46  ;;  %v285_v50 = vsub.f32 2.0, %v284_v47 }
  0x38   : > { %v286_v55 = vmul.f32 %v511_v45, %v285_v50  ;;  %v280_v59 = vsub.f32 0.0, %v279_v48 }
  0x3a   : > { %v287_v63 = vmul.f32 %v459_v49, %v286_v55 }
  0x3c   : > { %v288_v3 = vsel %vm632_vm10, %v287_v63, %v269_v38 }
  0x3d   : > { %v289_v4 = vsel %vm270_vm4, %v280_v59, %v288_v3 }
  0x3e   : > { %v290_v5 = vmul.f32 %v289_v4, %v289_v4 }
  0x40   : > { %v291_v7 = vmul.f32 0.080537446, %v290_v5 }
  0x42   : > { %v460_v8 = vadd.f32 -0.13877685, %v291_v7 }
  0x44   : > { %v293_v9 = vmul.f32 %v460_v8, %v290_v5 }
  0x46   : > { %v294_v11 = vadd.f32 0.19977711, %v293_v9 }
  0x48   : > { %v295_v12 = vmul.f32 %v294_v11, %v290_v5 }
  0x4a   : > { %v461_v6 = vadd.f32 -0.3333295, %v295_v12 }
  0x4c   : > { %v297_v14 = vmul.f32 %v461_v6, %v290_v5 }
  0x4e   : > { %v298_v15 = vmul.f32 %v297_v14, %v289_v4 }
  0x50   : > { %v299_v17 = vadd.f32 %v298_v15, %v289_v4 }
  0x52   : > { %v300_v22 = vadd.f32 %v299_v17, %v275_v16 }
  0x54   : > { %v301_v23 = vmul.f32 %v300_v22, %v268_v20 }
  0x56   : > { %v304_v24 = vadd.f32 3.1415927, %v301_v23  ;;  %v462_v25 = vadd.f32 -3.1415927, %v301_v23 }
  0x58   : > { %v306_v10 = vsel %vm303_vm12, %v304_v24, %v462_v25 }
  0x59   : > { %v307_v26 = vsel %vm302_vm13, %v301_v23, %v306_v10 }
  0x5a   : > { %v313_v27 = vsel %vm308_vm14, %v312_v60, %v307_v26 }
  0x5b   : > { %463 = vst [vmem:[%s588_s24 + $0x20] sm:$0xff] %v313_v27 }
  0x5c PF: > { %s12_s11 = sadd.s32 1, %s534_s11   ;;  %s669_s9 = smov %s530_s10 }
  0x5d   : > { %p9_p5 = scmp.ge.s32.totalorder %s12_s11, 4   ;;  %s670_s10 = smov %s672_s12 }
  0x5f   :  { %11 = sbr.rel (!%p9_p5) target bundleno = 2 (0x2), region = 81 }

</bundles_post_ra>
